<compile_context>
chip_gen: v7x
topology: tpu7x:2x2x1
jax: 0.10.0
libtpu: 0.0.40
codegen_flags: <defaults>
</compile_context>

<pallas_src>
import functools

import jax
import jax.numpy as jnp
from jax.experimental import pallas as pl
from jax.experimental.pallas import tpu as pltpu

IGNORE_INDEX = -100  # nn.CrossEntropyLoss default


def _ce_kernel(labels_ref, logits_ref, out_ref, *scratch,
               vocab_tile: int, vocab_size: int, num_vocab_tiles: int):
    """Online-logsumexp cross-entropy over vocab tiles.

    labels_ref: (1, RT, 1)  int32  shifted labels (padded rows = -100)
    logits_ref: (1, RT, VT) logits tile (rows [r*RT, ...), cols [v*VT, ...))
    out_ref   : (1, RT, 1)  f32    per-row loss (0 for ignored rows)
    scratch (only when num_vocab_tiles > 1):
      m_ref   : (RT, 1) f32 — running row max
      l_ref   : (RT, 1) f32 — running sum(exp(x - m))
      lab_ref : (RT, 1) f32 — accumulated raw label logit
    """
    x = logits_ref[0].astype(jnp.float32)             # (RT, VT)
    labels = labels_ref[0]                            # (RT, 1) int32

    # Single lane-iota shared by the label gather and the ragged-vocab mask.
    col = jax.lax.broadcasted_iota(jnp.int32, x.shape, 1)

    # Fold the tile's vocab offset into the (RT,1) labels (one scalar op per
    # row) instead of offsetting the (RT,VT) iota (one VPU op per element).
    if num_vocab_tiles == 1:
        local_labels = labels
    else:
        local_labels = labels - pl.program_id(2) * vocab_tile

    # Raw label logit: the label column appears in exactly one vocab tile, so a
    # plain accumulation (no rescale) is exact.  labels == -100 never matches.
    lab_tile = jnp.sum(jnp.where(col == local_labels, x, 0.0),
                       axis=-1, keepdims=True)

    # Mask out-of-range vocab columns — only emitted when V % VT != 0.
    if vocab_size % vocab_tile != 0:
        if num_vocab_tiles == 1:
            limit = vocab_size
        else:
            limit = vocab_size - pl.program_id(2) * vocab_tile
        x = jnp.where(col < limit, x, -jnp.inf)

    if num_vocab_tiles == 1:
        # Whole vocab in one tile: plain logsumexp, no online bookkeeping.
        m = jnp.max(x, axis=-1, keepdims=True)
        l = jnp.sum(jnp.exp(x - m), axis=-1, keepdims=True)
        loss = m + jnp.log(l) - lab_tile
        # jnp.where (not multiply-by-mask) so NaN/inf from ragged/garbage rows
        # never leaks into the reduction.
        out_ref[0] = jnp.where(labels != IGNORE_INDEX, loss, 0.0)
        return

    m_ref, l_ref, lab_ref = scratch
    v = pl.program_id(2)

    @pl.when(v == 0)
    def _():
        m_ref[...] = jnp.full_like(m_ref, -jnp.inf)
        l_ref[...] = jnp.zeros_like(l_ref)
        lab_ref[...] = jnp.zeros_like(lab_ref)

    lab_ref[...] += lab_tile

    # Online logsumexp update.
    m_old = m_ref[...]
    m_new = jnp.maximum(m_old, jnp.max(x, axis=-1, keepdims=True))
    alpha = jnp.exp(m_old - m_new)
    l_ref[...] = alpha * l_ref[...] + jnp.sum(jnp.exp(x - m_new),
                                              axis=-1, keepdims=True)
    m_ref[...] = m_new

    @pl.when(v == num_vocab_tiles - 1)
    def _():
        loss = m_ref[...] + jnp.log(l_ref[...]) - lab_ref[...]
        out_ref[0] = jnp.where(labels != IGNORE_INDEX, loss, 0.0)


@functools.partial(jax.jit, static_argnames=("row_tile", "vocab_tile"))
def gpt_lm_loss(logits: jax.Array, labels: jax.Array, *,
                row_tile: int = 256, vocab_tile: int = 2048) -> jax.Array:
    """Equivalent of GPTLMLoss.forward(logits, labels)."""
    B, S, V = logits.shape
    assert labels.shape == (B, S) and S >= 2

    R = S - 1  # number of prediction positions
    itemsize = jnp.dtype(logits.dtype).itemsize

    # Row tile: multiple of the sublane packing (16 for bf16, 8 otherwise).
    sub = 16 if logits.dtype == jnp.bfloat16 else 8
    rt = min(row_tile, ((R + sub - 1) // sub) * sub)
    rt = max(rt, sub)
    NR = pl.cdiv(R, rt)
    R_pad = NR * rt

    # Vocab tile: multiple of 128 (or the full vocab when it is small).
    if V <= 128:
        vt = V
    else:
        vt = min(vocab_tile, ((V + 127) // 128) * 128)
    # Keep the double-buffered logits working set well inside the default
    # scoped-VMEM budget (16 MiB on v5e, 32 MiB on v6e/v7x).
    while vt > 512 and 2 * rt * vt * itemsize > 6 * 1024 * 1024:
        vt = ((vt // 2) + 127) // 128 * 128
    NV = pl.cdiv(V, vt)

    # Shift + pad ONLY the labels (cheap: B*S int32).  shift_labels[b, j]
    # is the target for logits[b, j, :].
    shift_labels = labels[:, 1:].astype(jnp.int32)               # (B, R)
    if R_pad != R:
        shift_labels = jnp.pad(shift_labels, ((0, 0), (0, R_pad - R)),
                               constant_values=IGNORE_INDEX)
    count = jnp.sum((shift_labels != IGNORE_INDEX).astype(jnp.float32))
    labels3 = shift_labels.reshape(B, R_pad, 1)

    scratch_shapes = []
    if NV > 1:
        scratch_shapes = [
            pltpu.VMEM((rt, 1), jnp.float32),   # running max
            pltpu.VMEM((rt, 1), jnp.float32),   # running sum(exp)
            pltpu.VMEM((rt, 1), jnp.float32),   # label logit
        ]

    per_row = pl.pallas_call(
        functools.partial(_ce_kernel, vocab_tile=vt, vocab_size=V,
                          num_vocab_tiles=NV),
        out_shape=jax.ShapeDtypeStruct((B, R_pad, 1), jnp.float32),
        grid_spec=pltpu.PrefetchScalarGridSpec(
            num_scalar_prefetch=0,
            grid=(B, NR, NV),
            in_specs=[
                pl.BlockSpec((1, rt, 1), lambda b, r, v: (b, r, 0)),   # labels
                pl.BlockSpec((1, rt, vt), lambda b, r, v: (b, r, v)),  # logits
            ],
            out_specs=pl.BlockSpec((1, rt, 1), lambda b, r, v: (b, r, 0)),
            scratch_shapes=scratch_shapes,
        ),
        compiler_params=pltpu.CompilerParams(
            dimension_semantics=("parallel", "parallel", "arbitrary"),
        ),
        cost_estimate=pl.CostEstimate(
            flops=6 * B * R * V,
            transcendentals=B * R * V,
            bytes_accessed=B * S * V * itemsize + B * R_pad * 8,
        ),
    )(labels3, logits)

    return jnp.sum(per_row) / count


def _reference_loss(logits, labels):
    """Pure-JAX reference matching nn.CrossEntropyLoss (mean, ignore_index=-100)."""
    V = logits.shape[-1]
    sl = logits[:, :-1, :].reshape(-1, V).astype(jnp.float32)
    tl = labels[:, 1:].reshape(-1)
    valid = tl != IGNORE_INDEX
    safe_tl = jnp.where(valid, tl, 0)
    logp = jax.nn.log_softmax(sl, axis=-1)
    nll = -jnp.take_along_axis(logp, safe_tl[:, None], axis=-1)[:, 0]
    nll = jnp.where(valid, nll, 0.0)
    return jnp.sum(nll) / jnp.sum(valid.astype(jnp.float32))


if __name__ == "__main__":
    key = jax.random.PRNGKey(0)

    # Test 1: small shapes matching the module's expected usage (single vocab tile).
    B, S, V = 2, 8, 32
    k1, k2 = jax.random.split(key)
    logits = jax.random.normal(k1, (B, S, V), dtype=jnp.float32)
    labels = jax.random.randint(k2, (B, S), 0, V, dtype=jnp.int32)
    loss = gpt_lm_loss(logits, labels)
    jax.block_until_ready(loss)
    ref = _reference_loss(logits, labels)
    assert jnp.allclose(loss, ref, rtol=1e-5, atol=1e-5), (loss, ref)

    # Test 2: vocab tiling (NV > 1), ragged vocab / row tiles and ignore_index.
    B2, S2, V2 = 2, 30, 640
    k3, k4, k5 = jax.random.split(key, 3)
    logits2 = jax.random.normal(k3, (B2, S2, V2), dtype=jnp.float32)
    labels2 = jax.random.randint(k4, (B2, S2), 0, V2, dtype=jnp.int32)
    ignore_mask = jax.random.bernoulli(k5, 0.2, (B2, S2))
    labels2 = jnp.where(ignore_mask, IGNORE_INDEX, labels2)
    loss2 = gpt_lm_loss(logits2, labels2, vocab_tile=256)
    jax.block_until_ready(loss2)
    ref2 = _reference_loss(logits2, labels2)
    assert jnp.allclose(loss2, ref2, rtol=1e-5, atol=1e-5), (loss2, ref2)

    # Test 3: bf16 logits, online path with ragged vocab tile (sublane packing=16).
    B3, S3, V3 = 2, 17, 300
    k6, k7, k8 = jax.random.split(key, 3)
    logits3 = jax.random.normal(k6, (B3, S3, V3), dtype=jnp.float32).astype(jnp.bfloat16)
    labels3 = jax.random.randint(k7, (B3, S3), 0, V3, dtype=jnp.int32)
    ignore_mask3 = jax.random.bernoulli(k8, 0.25, (B3, S3))
    labels3 = jnp.where(ignore_mask3, IGNORE_INDEX, labels3)
    loss3 = gpt_lm_loss(logits3, labels3, vocab_tile=128)
    jax.block_until_ready(loss3)
    ref3 = _reference_loss(logits3, labels3)
    assert jnp.allclose(loss3, ref3, rtol=1e-4, atol=1e-4), (loss3, ref3)

    print("KERNEL_OK")
</pallas_src>

<mosaic_0001>
module attributes {stable_mosaic.version = 11 : i64} {
  func.func @_ce_kernel(%arg0: i32, %arg1: i32, %arg2: i32, %arg3: memref<1x8x1xi32, #tpu.memory_space<vmem>>, %arg4: memref<1x8x32xf32, #tpu.memory_space<vmem>>, %arg5: memref<1x8x1xf32, #tpu.memory_space<vmem>>) attributes {dimension_semantics = [#tpu.dimension_semantics<parallel>, #tpu.dimension_semantics<parallel>, #tpu.dimension_semantics<arbitrary>], iteration_bounds = array<i64: 2, 1, 1>, scalar_prefetch = 0 : i64, scratch_operands = 0 : i64, tpu.core_type = #tpu.core_type<tc>, window_params = [{transform_indices = @transform_0, window_bounds = array<i64: 1, 8, 1>}, {transform_indices = @transform_1, window_bounds = array<i64: 1, 8, 32>}, {transform_indices = @transform_2, window_bounds = array<i64: 1, 8, 1>}]} {
    %c0 = arith.constant 0 : index
    %c0_0 = arith.constant 0 : index
    %c0_1 = arith.constant 0 : index
    %0 = vector.load %arg4[%c0, %c0_0, %c0_1] : memref<1x8x32xf32, #tpu.memory_space<vmem>>, vector<1x8x32xf32>
    %1 = vector.shape_cast %0 : vector<1x8x32xf32> to vector<8x32xf32>
    %c0_2 = arith.constant 0 : index
    %c0_3 = arith.constant 0 : index
    %c0_4 = arith.constant 0 : index
    %2 = vector.load %arg3[%c0_2, %c0_3, %c0_4] : memref<1x8x1xi32, #tpu.memory_space<vmem>>, vector<1x8x1xi32>
    %3 = vector.shape_cast %2 : vector<1x8x1xi32> to vector<8x1xi32>
    %4 = tpu.iota {dimensions = array<i32: 1>} : vector<8x32xi32>
    %5 = vector.broadcast %3 : vector<8x1xi32> to vector<8x32xi32>
    %6 = arith.cmpi eq, %4, %5 : vector<8x32xi32>
    %cst = arith.constant 0.000000e+00 : f32
    %7 = vector.broadcast %cst : f32 to vector<8x32xf32>
    %8 = arith.select %6, %1, %7 : vector<8x32xi1>, vector<8x32xf32>
    %cst_5 = arith.constant dense<0.000000e+00> : vector<8xf32>
    %9 = vector.multi_reduction <add>, %8, %cst_5 [1] : vector<8x32xf32> to vector<8xf32>
    %10 = vector.shape_cast %9 : vector<8xf32> to vector<8x1xf32>
    %cst_6 = arith.constant dense<0xFF800000> : vector<8xf32>
    %11 = vector.multi_reduction <maximumf>, %1, %cst_6 [1] : vector<8x32xf32> to vector<8xf32>
    %12 = vector.shape_cast %11 : vector<8xf32> to vector<8x1xf32>
    %13 = vector.broadcast %12 : vector<8x1xf32> to vector<8x32xf32>
    %14 = arith.subf %1, %13 : vector<8x32xf32>
    %15 = math.exp %14 : vector<8x32xf32>
    %cst_7 = arith.constant dense<0.000000e+00> : vector<8xf32>
    %16 = vector.multi_reduction <add>, %15, %cst_7 [1] : vector<8x32xf32> to vector<8xf32>
    %17 = vector.shape_cast %16 : vector<8xf32> to vector<8x1xf32>
    %18 = math.log %17 : vector<8x1xf32>
    %19 = arith.addf %12, %18 : vector<8x1xf32>
    %20 = arith.subf %19, %10 : vector<8x1xf32>
    %c-100_i32 = arith.constant -100 : i32
    %21 = vector.broadcast %c-100_i32 : i32 to vector<8x1xi32>
    %22 = arith.cmpi ne, %3, %21 : vector<8x1xi32>
    %cst_8 = arith.constant 0.000000e+00 : f32
    %23 = vector.broadcast %cst_8 : f32 to vector<8x1xf32>
    %24 = arith.select %22, %20, %23 : vector<8x1xi1>, vector<8x1xf32>
    %c0_9 = arith.constant 0 : index
    %c0_10 = arith.constant 0 : index
    %c0_11 = arith.constant 0 : index
    %25 = vector.load %arg5[%c0_9, %c0_10, %c0_11] : memref<1x8x1xf32, #tpu.memory_space<vmem>>, vector<1x8x1xf32>
    %26 = vector.shape_cast %25 : vector<1x8x1xf32> to vector<8x1xf32>
    %27 = vector.shape_cast %24 : vector<8x1xf32> to vector<1x8x1xf32>
    tpu.vector_store %arg5[%c0_9, %c0_10, %c0_11], %27 {strides = array<i32>} : memref<1x8x1xf32, #tpu.memory_space<vmem>>, vector<1x8x1xf32>,
    return
  }
  func.func @transform_0(%arg0: i32, %arg1: i32, %arg2: i32) -> (i32, i32, i32) {
    %c0_i32 = arith.constant 0 : i32
    %c0_i32_0 = arith.constant 0 : i32
    return %arg0, %arg1, %c0_i32 : i32, i32, i32
  }
  func.func @transform_1(%arg0: i32, %arg1: i32, %arg2: i32) -> (i32, i32, i32) {
    %c0_i32 = arith.constant 0 : i32
    return %arg0, %arg1, %arg2 : i32, i32, i32
  }
  func.func @transform_2(%arg0: i32, %arg1: i32, %arg2: i32) -> (i32, i32, i32) {
    %c0_i32 = arith.constant 0 : i32
    %c0_i32_0 = arith.constant 0 : i32
    return %arg0, %arg1, %c0_i32 : i32, i32, i32
  }
}

</mosaic_0001>

<bundles_post_ra>
// kernel: gpt_lm_loss.1
= control target key start
LH: loop header
LB: loop body
LE: loop exit
PB: predicated region body
PF: predicated region fallthrough
CT: control target
= control target key end

     0   :  { %s421_s9 = smov 0   ;;  %s423_s10 = smov 0   ;;  %s465_s0 = inlined_call_operand.vmem [shape: s32[2,8,1], index: 0, kind: input, shape index: {}]   ;;  %s466_s1 = inlined_call_operand.vmem [shape: f32[2,8,32], index: 1, kind: input, shape index: {}]   ;;  %s467_s2 = inlined_call_operand.vmem [shape: f32[2,8,1], index: 2, kind: output, shape index: {}]  }
   0x1   :  { %s425_s11 = smov 0  }
   0x2 LB: > { %s31_s12 = sadd.s32 1, %s399_s10  ;;  %p345_p0 = scmp.ge.s32.totalorder %s403_s11, 1  ;;  %s403_s11 = sphi %s425_s11, %s12_s11   ;;  %s399_s10 = sphi %s423_s10, %s469_s10   ;;  %s395_s9 = sphi %s421_s9, %s468_s9  }
   0x3   : > { %p33_p1 = scmp.ge.s32.totalorder %s31_s12, 2  ;;  %p156_p2 = scmp.lt.s32.totalorder %s403_s11, 3 }
   0x5   : > { %s471_s12 = smov (%p33_p1, %s31_s12), 0  ;;  %p157_p3 = pnand %p345_p0, %p156_p2 }
   0x6   : > { %p192_p4 = scmp.lt.s32.totalorder (!%p157_p3), %s395_s9, 1  ;;  %v405_v0 = vmov (!%p157_p3), 0   ;;  %vm225_vm0 = vcmask (!%p157_p3), 261120   ;;  %v218_v7 = vlaneseq (!%p157_p3)  ;;  %vm244_vm3 = vcmask (!%p157_p3), 7168  }
   0x7   : > { %160 = sbr.rel (%p157_p3) target bundleno = 338 (0x152), region = 28  ;;  %376 = vset.pattern.permute.xlu0 (!%p157_p3), %v405_v0 }
   0x8   : > { %v219_v8 = vand.u32 (!%p157_p3), 127, %v218_v7 }
   0xe   : > { %s473_s9 = smov (!%p192_p4, %s395_s9), 1 }
   0xf   : > { %s439_s13 = sshll.u32 %s473_s9, 3 }
  0x10   : > { %s208_s16 = scalar_lea.vmem %s466_s1, %s439_s13  ;;  %s198_s19 = scalar_lea.vmem %s465_s0, %s439_s13 }
  0x11   : > { %v216_v1 = vld [vmem:[%s208_s16] sm:$0xff]  ;;  %s215_s22 = scalar_lea.vmem %s467_s2, %s439_s13 }
  0x12   : > { %v229_v2 = vsel %vm225_vm0, %v216_v1, -inf  ;;  %v217_v3 = vld [vmem:[%s198_s19] sm:$0xff] }
  0x13   : > { %230 = vmax.xlane.f32.xlu0 %v229_v2  ;;  %vm242_vm2 = vcmp.ne.s32.totalorder %v217_v3, 4294967196 }
  0x29   : > { %221 = vperm.xlu0 %376, %v217_v3  }
  0xa0   : > { %v231_v4 = vpop.xlane.xlu0 %230 }
  0xa1   : > { %v232_v5 = vsub.f32 %v216_v1, %v231_v4 }
  0xa3   : > { %v233_v6 = vmul.f32 1.442695, %v232_v5 }
  0xa5   : > { %377 = vpow2.f32 %v233_v6 }
  0xa8   : > { %v222_v9 = vpop.permute.xlu0 %221 }
  0xa9   : > { %vm223_vm1 = vcmp.eq.s32.totalorder %v219_v8, %v222_v9 }
  0xaa   : > { %v224_v11 = vsel %vm223_vm1, %v216_v1, 0.0 }
  0xab   : > { %v226_v13 = vsel %vm225_vm0, %v224_v11, 0.0 }
  0xaf   : > { %v378_v10 = vpop.eup %377 }
  0xb0   : > { %v235_v12 = vsel %vm225_vm0, %v378_v10, 0.0 }
  0xb1   : > { %236 = vadd.xlane.f32.xlu1 %v235_v12 }
  0xb5   : > { %227 = vadd.xlane.f32.xlu1 %v226_v13 }
 0x13e   : > { %v237_v14 = vpop.xlane.xlu1 %236 }
 0x13f   : > { %379 = vlog2.f32 %v237_v14 }
 0x142   : > { %v228_v17 = vpop.xlane.xlu1 %227 }
 0x149   : > { %v380_v15 = vpop.eup %379 }
 0x14a   : > { %v239_v16 = vmul.f32 0.6931472, %v380_v15 }
 0x14c   : > { %v240_v18 = vadd.f32 %v239_v16, %v231_v4 }
 0x14e   : > { %v241_v19 = vsub.f32 %v240_v18, %v228_v17 }
 0x150   : > { %v243_v20 = vsel %vm242_vm2, %v241_v19, 0.0 }
 0x151   : > { %245 = vst.msk [vmem:[%s215_s22] sm:$0xff] %vm244_vm3, %v243_v20 }
 0x152 PF: > { %s12_s11 = sadd.s32 1, %s403_s11   ;;  %s468_s9 = smov %s399_s10 }
 0x153   : > { %p9_p5 = scmp.ge.s32.totalorder %s12_s11, 4   ;;  %s469_s10 = smov %s471_s12 }
 0x155   :  { %11 = sbr.rel (!%p9_p5) target bundleno = 2 (0x2), region = 61 }

</bundles_post_ra>
